<compile_context>
chip_gen: v5e
topology: v5e:2x2
jax: 0.10.0
libtpu: 0.0.40
codegen_flags: <defaults>
</compile_context>

<pallas_src>
import functools

import jax
import jax.numpy as jnp
import numpy as np
from jax import lax
from jax.experimental import pallas as pl
from jax.experimental.pallas import tpu as pltpu


def _round_up(x, m):
    return (x + m - 1) // m * m


# VMEM budgets (bytes) for the double-buffered tiles.
_A_BUDGET = 8 * 1024 * 1024     # 2 x (TM, TK) bf16
_B_BUDGET = 10 * 1024 * 1024    # 2 x (TK, TN) bf16
_O_BUDGET = 4 * 1024 * 1024     # 2 x (TM, TN) bf16
_VMEM_LIMIT = 32 * 1024 * 1024


# ----------------------------------------------------------------------------
# Pallas kernels: tiled matmul (bf16 x bf16 -> f32 acc) + fused bias/act, bf16
# output.  Grid = (M tiles, N tiles[, K tiles]); M and N are "parallel" (v7x
# megacore), K (when present) is the innermost "arbitrary" reduction axis.
# ----------------------------------------------------------------------------
def _apply_act(r, act):
    if act == "relu":
        return jnp.maximum(r, 0.0)
    if act == "tanh":
        return jnp.tanh(r)
    return r


def _mm_single_k_kernel(a_ref, b_ref, bias_ref, o_ref, *, act):
    # One pass: dot + bias + activation + bf16 store (no accumulator RMW).
    r = jnp.dot(a_ref[...], b_ref[...], preferred_element_type=jnp.float32)
    r = _apply_act(r + bias_ref[...], act)
    o_ref[...] = r.astype(o_ref.dtype)


def _mm_multi_k_kernel(a_ref, b_ref, bias_ref, o_ref, acc_ref, *, act):
    # Only used when kt >= 2: f32 VMEM accumulator, bf16 store on last k-step
    # with the final partial dot + bias fused into the epilogue.
    k = pl.program_id(2)
    kt = pl.num_programs(2)
    part = jnp.dot(a_ref[...], b_ref[...], preferred_element_type=jnp.float32)

    @pl.when(k == 0)
    def _():
        acc_ref[...] = part

    @pl.when(jnp.logical_and(k > 0, k < kt - 1))
    def _():
        acc_ref[...] += part

    @pl.when(k == kt - 1)
    def _():
        r = _apply_act(acc_ref[...] + part + bias_ref[...], act)
        o_ref[...] = r.astype(o_ref.dtype)


def _choose_tm(m, cap):
    """TM must be a multiple of 8 (or the padded M itself).  Prefer a divisor
    of M so no ragged-M pad of the A matrix is needed."""
    cap = max(8, cap)
    if m <= cap:
        if m % 8 == 0:
            return m, m
        tm = _round_up(m, 8)
        return tm, tm
    d = (cap // 8) * 8
    while d >= 8:
        if m % d == 0:
            return d, m
        d -= 8
    tm = (cap // 8) * 8
    return tm, _round_up(m, tm)


def matmul_bias_act(a, b, bias, act="none", out_dtype=jnp.bfloat16):
    """out = act(a @ b + bias); a:(M,K), b:(K,N), bias:(N,).
    bf16 operands, f32 MXU accumulation, fused bias/act, bf16 output."""
    m, k = a.shape
    k2, n = b.shape
    assert k == k2
    kp = _round_up(k, 128)
    npad = _round_up(n, 128)

    tn = npad if npad <= 512 else 512
    tk = kp
    while 4 * tk * tn > _B_BUDGET and tk % 2 == 0 and tk >= 256:
        tk //= 2
    assert kp % tk == 0
    kt = kp // tk

    cap = min(_A_BUDGET // (4 * tk), _O_BUDGET // (4 * tn))
    tm, mp = _choose_tm(m, cap)

    a = a.astype(jnp.bfloat16)
    if (mp, kp) != (m, k):
        a = jnp.pad(a, ((0, mp - m), (0, kp - k)))
    b = b.astype(jnp.bfloat16)
    if (kp, npad) != (k, n):
        b = jnp.pad(b, ((0, kp - k), (0, npad - n)))
    bias2 = bias.astype(jnp.float32)
    if npad != n:
        bias2 = jnp.pad(bias2, (0, npad - n))
    bias2 = bias2.reshape(1, npad)

    if kt == 1:
        params = pltpu.CompilerParams(
            dimension_semantics=("parallel", "parallel"),
            vmem_limit_bytes=_VMEM_LIMIT)
        out = pl.pallas_call(
            functools.partial(_mm_single_k_kernel, act=act),
            out_shape=jax.ShapeDtypeStruct((mp, npad), out_dtype),
            grid_spec=pltpu.PrefetchScalarGridSpec(
                num_scalar_prefetch=0,
                grid=(mp // tm, npad // tn),
                in_specs=[
                    pl.BlockSpec((tm, tk), lambda i, j: (i, 0)),
                    pl.BlockSpec((tk, tn), lambda i, j: (0, j)),
                    pl.BlockSpec((1, tn), lambda i, j: (0, j)),
                ],
                out_specs=pl.BlockSpec((tm, tn), lambda i, j: (i, j)),
            ),
            compiler_params=params,
        )(a, b, bias2)
    else:
        params = pltpu.CompilerParams(
            dimension_semantics=("parallel", "parallel", "arbitrary"),
            vmem_limit_bytes=_VMEM_LIMIT)
        out = pl.pallas_call(
            functools.partial(_mm_multi_k_kernel, act=act),
            out_shape=jax.ShapeDtypeStruct((mp, npad), out_dtype),
            grid_spec=pltpu.PrefetchScalarGridSpec(
                num_scalar_prefetch=0,
                grid=(mp // tm, npad // tn, kt),
                in_specs=[
                    pl.BlockSpec((tm, tk), lambda i, j, kk: (i, kk)),
                    pl.BlockSpec((tk, tn), lambda i, j, kk: (kk, j)),
                    pl.BlockSpec((1, tn), lambda i, j, kk: (0, j)),
                ],
                out_specs=pl.BlockSpec((tm, tn), lambda i, j, kk: (i, j)),
                scratch_shapes=[pltpu.VMEM((tm, tn), jnp.float32)],
            ),
            compiler_params=params,
        )(a, b, bias2)

    if (mp, npad) != (m, n):
        out = out[:m, :n]
    return out


# ----------------------------------------------------------------------------
# Plain-JAX glue (bf16): im2col patch extraction, conv / conv-transpose.
# ----------------------------------------------------------------------------
def _im2col(x, kh_sz, kw_sz, stride):
    """x: (N, Hp, Wp, C) already padded.  Returns (N*Ho*Wo, KH*KW*C), Ho, Wo.
    Column order is (kh, kw, c)."""
    n, hp, wp, c = x.shape
    ho = (hp - kh_sz) // stride + 1
    wo = (wp - kw_sz) // stride + 1
    cols = []
    for kh in range(kh_sz):
        for kw in range(kw_sz):
            cols.append(
                lax.slice(x, (0, kh, kw, 0),
                          (n, kh + stride * (ho - 1) + 1,
                           kw + stride * (wo - 1) + 1, c),
                          (1, stride, stride, 1)))
    patches = jnp.concatenate(cols, axis=-1)               # (N, Ho, Wo, KH*KW*C)
    return patches.reshape(n * ho * wo, kh_sz * kw_sz * c), ho, wo


def conv2d_4x4_s2(x, w, b, act):
    """x: (N,H,W,Cin); w: (Cout,Cin,4,4) torch Conv2d layout; b: (Cout,)."""
    n = x.shape[0]
    cout = w.shape[0]
    x = x.astype(jnp.bfloat16)
    xp = jnp.pad(x, ((0, 0), (1, 1), (1, 1), (0, 0)))
    # weight rows ordered (kh, kw, cin) to match the im2col column order
    w_mat = jnp.transpose(w, (2, 3, 1, 0)).reshape(-1, cout)
    patches, ho, wo = _im2col(xp, 4, 4, stride=2)
    y = matmul_bias_act(patches, w_mat, b, act)
    return y.reshape(n, ho, wo, cout)


def _deconv_weight_matrix(w_t):
    """w_t: (Cin,Cout,4,4) torch ConvTranspose2d weight -> (4*Cin, 4*Cout).
    Rows ordered (window_r, window_c, cin) to match the 2x2 im2col; columns
    ordered (phase = 2*dr + dc, cout) where (dr, dc) is output-pixel parity."""
    phase_cols = []
    for dr in (0, 1):
        for dc in (0, 1):
            rows = []
            for wr in (0, 1):
                for wc in (0, 1):
                    kr = 3 - dr - 2 * wr
                    kc = 3 - dc - 2 * wc
                    rows.append(w_t[:, :, kr, kc])          # (Cin, Cout)
            phase_cols.append(jnp.concatenate(rows, axis=0))
    return jnp.concatenate(phase_cols, axis=1)              # (4*Cin, 4*Cout)


def conv_transpose2d_4x4_s2(x, w_t, b, act):
    """Phase-decomposed ConvTranspose2d(k=4, s=2, p=1, output_padding=0).
    x: (N,H,W,Cin); w_t: (Cin,Cout,4,4); b: (Cout,).  Output (N,2H,2W,Cout).
    All 4 output parity phases share one 2x2 im2col and one matmul against a
    (4*Cin, 4*Cout) weight.  Width padding is over-extended so the patch-row
    count has a multiple-of-8 divisor (no ragged-M pad of the patch matrix);
    the extra columns are zeros and are cropped away after the matmul."""
    n, h, w, cin = x.shape
    cout = w_t.shape[1]
    x = x.astype(jnp.bfloat16)
    extra_w = (-(w + 1)) % 8
    xp = jnp.pad(x, ((0, 0), (1, 1), (1, 1 + extra_w), (0, 0)))
    patches, hp1, wp1 = _im2col(xp, 2, 2, stride=1)   # rows = (H+1)*(W+1+extra)
    w_mat = _deconv_weight_matrix(w_t)
    bias4 = jnp.tile(b, 4)                            # phase-major bias
    y = matmul_bias_act(patches, w_mat, bias4, act)   # (rows, 4*Cout) bf16
    y = y.reshape(n, hp1, wp1, 4, cout)

    # depth-to-space: out[:, 2m+dr, 2n+dc] = y[:, m+dr, n+dc, 2*dr+dc]
    phases = []
    for dr in (0, 1):
        for dc in (0, 1):
            p = 2 * dr + dc
            phases.append(y[:, dr:dr + h, dc:dc + w, p, :])     # (N,H,W,Cout)
    ph = jnp.stack(phases, axis=3).reshape(n, h, w, 2, 2, cout)
    out = jnp.transpose(ph, (0, 1, 3, 2, 4, 5)).reshape(n, 2 * h, 2 * w, cout)
    return out


# ----------------------------------------------------------------------------
# UnetGenerator forward (matches the PyTorch module graph).
# ----------------------------------------------------------------------------
def unet_forward(x_nchw, params):
    # module_0 / module_1 (Input, quant_input) and module_54 (dequant_output)
    # are identity in float semantics.
    x = jnp.transpose(x_nchw, (0, 2, 3, 1)).astype(jnp.bfloat16)  # NCHW->NHWC

    downs = []
    h = x
    for (w, b) in params["down"]:                      # modules 2..23
        h = conv2d_4x4_s2(h, w, b, act="relu")
        downs.append(h)

    # up path: convT + ReLU, then Cat([skip, up], dim=channels)
    for idx in range(7):                               # modules 24..51
        w, b = params["up"][idx]
        h = conv_transpose2d_4x4_s2(h, w, b, act="relu")
        h = jnp.concatenate([downs[6 - idx], h], axis=-1)
    # TODO(synk): the skip concat could be removed entirely by splitting the
    # next deconv's weight rows into skip/up halves and summing two matmuls.

    w, b = params["up"][7]                             # module_52 + Tanh
    h = conv_transpose2d_4x4_s2(h, w, b, act="tanh")

    return jnp.transpose(h, (0, 3, 1, 2)).astype(jnp.float32)     # NHWC->NCHW


# ----------------------------------------------------------------------------
# Deterministic synthetic parameters (shapes from the module __init__).
# ----------------------------------------------------------------------------
def init_params(key, scale=0.05):
    down_specs = [  # (Cin, Cout, has_bias)
        (3, 64, False), (64, 128, True), (128, 256, True), (256, 512, True),
        (512, 512, True), (512, 512, True), (512, 512, True), (512, 512, False),
    ]
    up_specs = [  # (Cin, Cout) — all ConvTranspose2d have bias=True
        (512, 512), (1024, 512), (1024, 512), (1024, 512),
        (1024, 256), (512, 128), (256, 64), (128, 3),
    ]
    keys = jax.random.split(key, len(down_specs) + len(up_specs))
    params = {"down": [], "up": []}
    for i, (cin, cout, has_bias) in enumerate(down_specs):
        w = scale * jax.random.normal(keys[i], (cout, cin, 4, 4), jnp.float32)
        b = (scale * jnp.ones((cout,), jnp.float32)) if has_bias \
            else jnp.zeros((cout,), jnp.float32)
        params["down"].append((w, b))
    for j, (cin, cout) in enumerate(up_specs):
        k = keys[len(down_specs) + j]
        w = scale * jax.random.normal(k, (cin, cout, 4, 4), jnp.float32)
        b = scale * jnp.ones((cout,), jnp.float32)
        params["up"].append((w, b))
    return params


def _reference_deconv(x, w_t, b):
    """Direct (PyTorch-semantics) ConvTranspose2d(k=4,s=2,p=1) in numpy, NHWC."""
    n, h, w, cin = x.shape
    cout = w_t.shape[1]
    out = np.zeros((n, 2 * h, 2 * w, cout), np.float32)
    for qy in range(h):
        for qx in range(w):
            for kh in range(4):
                for kw in range(4):
                    py, px = 2 * qy - 1 + kh, 2 * qx - 1 + kw
                    if 0 <= py < 2 * h and 0 <= px < 2 * w:
                        out[:, py, px, :] += x[:, qy, qx, :] @ w_t[:, :, kh, kw]
    return out + b


if __name__ == "__main__":
    key = jax.random.PRNGKey(0)
    pkey, xkey, ckey = jax.random.split(key, 3)

    # Tiny structural self-check of the phase-decomposed ConvTranspose2d.
    wt = 0.5 * jax.random.normal(ckey, (2, 3, 4, 4), jnp.float32)
    bt = jnp.array([0.1, -0.2, 0.3], jnp.float32)
    xt = 0.5 * jax.random.normal(jax.random.fold_in(ckey, 1),
                                 (1, 4, 4, 2), jnp.float32)
    got = np.asarray(conv_transpose2d_4x4_s2(xt, wt, bt, act="none"),
                     dtype=np.float32)
    ref = _reference_deconv(np.asarray(xt), np.asarray(wt), np.asarray(bt))
    assert np.allclose(got, ref, rtol=1e-1, atol=1e-1), float(np.abs(got - ref).max())

    params = init_params(pkey)
    # 8 stride-2 downsamples -> minimum consistent spatial size is 256; batch=1.
    x = jax.random.normal(xkey, (1, 3, 256, 256), jnp.float32)

    fwd = jax.jit(unet_forward)
    y = jax.block_until_ready(fwd(x, params))

    assert y.shape == (1, 3, 256, 256), y.shape
    assert bool(jnp.all(jnp.isfinite(y)))
    assert bool(jnp.all(jnp.abs(y) <= 1.0 + 1e-3))   # tanh output range
    print("KERNEL_OK")
</pallas_src>

<mosaic_0001>
module attributes {stable_mosaic.version = 11 : i64} {
  func.func @_mm_single_k_kernel(%arg0: i32, %arg1: i32, %arg2: memref<40x128xbf16, #tpu.memory_space<vmem>>, %arg3: memref<128x128xbf16, #tpu.memory_space<vmem>>, %arg4: memref<1x128xf32, #tpu.memory_space<vmem>>, %arg5: memref<40x128xbf16, #tpu.memory_space<vmem>>) attributes {dimension_semantics = [#tpu.dimension_semantics<parallel>, #tpu.dimension_semantics<parallel>], iteration_bounds = array<i64: 1, 1>, scalar_prefetch = 0 : i64, scratch_operands = 0 : i64, tpu.core_type = #tpu.core_type<tc>, window_params = [{transform_indices = @transform_0, window_bounds = array<i64: 40, 128>}, {transform_indices = @transform_1, window_bounds = array<i64: 128, 128>}, {transform_indices = @transform_2, window_bounds = array<i64: 1, 128>}, {transform_indices = @transform_3, window_bounds = array<i64: 40, 128>}]} {
    %c0 = arith.constant 0 : index
    %c0_0 = arith.constant 0 : index
    %0 = vector.load %arg2[%c0, %c0_0] : memref<40x128xbf16, #tpu.memory_space<vmem>>, vector<40x128xbf16>
    %c0_1 = arith.constant 0 : index
    %c0_2 = arith.constant 0 : index
    %1 = vector.load %arg3[%c0_1, %c0_2] : memref<128x128xbf16, #tpu.memory_space<vmem>>, vector<128x128xbf16>
    %cst = arith.constant dense<0.000000e+00> : vector<40x128xf32>
    %2 = tpu.matmul %0, %1, %cst {dimension_numbers = #tpu.dot_dimension_numbers<[1], [0], [0], [1], [0, 0, 1, 1], [], []>} : vector<40x128xbf16>, vector<128x128xbf16>, vector<40x128xf32> -> vector<40x128xf32>
    %c0_3 = arith.constant 0 : index
    %c0_4 = arith.constant 0 : index
    %3 = vector.load %arg4[%c0_3, %c0_4] : memref<1x128xf32, #tpu.memory_space<vmem>>, vector<1x128xf32>
    %4 = vector.broadcast %3 : vector<1x128xf32> to vector<40x128xf32>
    %5 = arith.addf %2, %4 : vector<40x128xf32>
    %6 = arith.truncf %5 : vector<40x128xf32> to vector<40x128xbf16>
    %c0_5 = arith.constant 0 : index
    %c0_6 = arith.constant 0 : index
    %7 = vector.load %arg5[%c0_5, %c0_6] : memref<40x128xbf16, #tpu.memory_space<vmem>>, vector<40x128xbf16>
    tpu.vector_store %arg5[%c0_5, %c0_6], %6 {strides = array<i32>} : memref<40x128xbf16, #tpu.memory_space<vmem>>, vector<40x128xbf16>,
    return
  }
  func.func @transform_0(%arg0: i32, %arg1: i32) -> (i32, i32) {
    %c0_i32 = arith.constant 0 : i32
    %c0_i32_0 = arith.constant 0 : i32
    return %arg0, %c0_i32 : i32, i32
  }
  func.func @transform_1(%arg0: i32, %arg1: i32) -> (i32, i32) {
    %c0_i32 = arith.constant 0 : i32
    %c0_i32_0 = arith.constant 0 : i32
    return %c0_i32, %arg1 : i32, i32
  }
  func.func @transform_2(%arg0: i32, %arg1: i32) -> (i32, i32) {
    %c0_i32 = arith.constant 0 : i32
    %c0_i32_0 = arith.constant 0 : i32
    return %c0_i32, %arg1 : i32, i32
  }
  func.func @transform_3(%arg0: i32, %arg1: i32) -> (i32, i32) {
    %c0_i32 = arith.constant 0 : i32
    return %arg0, %arg1 : i32, i32
  }
}

</mosaic_0001>

<bundles_post_ra>
// kernel: tpu_custom_call.1
= control target key start
LH: loop header
LB: loop body
LE: loop exit
PB: predicated region body
PF: predicated region fallthrough
CT: control target
= control target key end

     0   :  { %8 = vsyncpa [#allocation3], 0  ;;  %s396_s0 = inlined_call_operand.hbm [shape: bf16[40,128], index: 0, kind: input, shape index: {}]   ;;  %s397_s1 = inlined_call_operand.hbm [shape: bf16[128,128], index: 1, kind: input, shape index: {}]   ;;  %s398_s2 = inlined_call_operand.vmem [shape: f32[1,128], index: 2, kind: input, shape index: {}]   ;;  %s399_s3 = inlined_call_operand.hbm [shape: bf16[40,128], index: 3, kind: output, shape index: {}]  }
   0x1   :  { %9 = vsyncpa [#allocation6], 0 }
   0x2   :  { %10 = vsyncpa [#allocation4], 0  ;;  %s15_s14 = sshll.u32 %s396_s0, 4  ;;  %s350_s15 = smov [#allocation2]   ;;  %s16_s14 = int_to_ptr.hbm [resolvable:$true] %s15_s14 }
   0x3   :  { %s17_s16 = sshll.u32 %s350_s15, 4  ;;  %s28_s19 = sshll.u32 %s397_s1, 4  ;;  %s18_s16 = int_to_ptr.vmem [resolvable:$true] %s17_s16  ;;  %s29_s19 = int_to_ptr.hbm [resolvable:$true] %s28_s19 }
   0x4   :  { %s351_s20 = smov 64   ;;  %s352_s21 = smov 4  }
   0x5   :  { %23 = dma.hbm_to_vmem [thread:$0]  %s16_s14, 320, %s18_s16, [#allocation3], %s351_s20, %s351_s20, %s352_s21  }
   0x6   :  { %s353_s22 = smov [#allocation5]  }
   0x7   :  { %s30_s23 = sshll.u32 %s353_s22, 4  ;;  %s31_s23 = int_to_ptr.vmem [resolvable:$true] %s30_s23 }
   0x8   :  { %36 = dma.hbm_to_vmem [thread:$0]  %s29_s19, 1024, %s31_s23, [#allocation6], %s351_s20, %s351_s20, %s352_s21  }
   0x9   :  { %344 = dma.done.wait [#allocation3], 320  }
   0xa   :  { %345 = vsyncadd [#allocation3], 4294966976 }
   0xb   :  { %346 = dma.done.wait [#allocation6], 1024  }
   0xc   :  { %347 = vsyncadd [#allocation6], 4294966272  ;;  %v238_v0 = vld [vmem:[#allocation5 + $0x38] sm:$0xff]  ;;  %v237_v1 = vld [vmem:[#allocation5 + $0x30] sm:$0xff]  ;;  %s354_s24 = smov [#allocation7]   ;;  %s175_s28 = sshll.u32 %s399_s3, 4  ;;  %s176_s28 = int_to_ptr.hbm [resolvable:$true] %s175_s28 }
   0xd   :  { %136 = vmatpush.bf16.msra.mxu0 %v238_v0  ;;  %250 = vmatpush.bf16.msra.mxu1 %v238_v0  ;;  %v236_v2 = vld [vmem:[#allocation5 + $0x28] sm:$0xff]  ;;  %v235_v3 = vld [vmem:[#allocation5 + $0x20] sm:$0xff]  ;;  %v234_v4 = vld [vmem:[#allocation5 + $0x18] sm:$0xff]  ;;  %s173_s25 = sshll.u32 %s354_s24, 4  ;;  %s174_s25 = int_to_ptr.vmem [resolvable:$true] %s173_s25 }
   0xe   :  { %251 = vmatpush.bf16.msra.mxu2 %v238_v0  ;;  %v233_v5 = vld [vmem:[#allocation5 + $0x10] sm:$0xff]  ;;  %v232_v6 = vld [vmem:[#allocation5 + $0x8] sm:$0xff]  ;;  %v51_v7 = vld [vmem:[#allocation2 + $0x10] sm:$0xf] }
   0xf   :  { %v231_v8 = vld [vmem:[#allocation5] sm:$0xff]  ;;  %v81_v9 = vunpack.c.l.b16 %v51_v7  ;;  %v229_v10 = vld [vmem:[#allocation2] sm:$0xff]  ;;  %v230_v11 = vld [vmem:[#allocation2 + $0x8] sm:$0xff] }
  0x10   :  { %v271_v15 = vld [vmem:[%s398_s2] ss:$0 sm:$0xff] }
  0x11   :  { %137 = vmatpush.bf16.msra.mxu0 %v237_v1  ;;  %252 = vmatpush.bf16.msra.mxu1 %v237_v1  ;;  %v84_v12 = vpack.c.b16 %v81_v9, %v81_v9 }
  0x12   :  { %253 = vmatpush.bf16.msra.mxu2 %v237_v1 }
  0x15   :  { %138 = vmatpush.bf16.msra.mxu0 %v236_v2  ;;  %254 = vmatpush.bf16.msra.mxu1 %v236_v2 }
  0x16   :  { %255 = vmatpush.bf16.msra.mxu2 %v236_v2 }
  0x19   :  { %139 = vmatpush.bf16.msra.mxu0 %v235_v3  ;;  %256 = vmatpush.bf16.msra.mxu1 %v235_v3 }
  0x1a   :  { %257 = vmatpush.bf16.msra.mxu2 %v235_v3 }
  0x1d   :  { %140 = vmatpush.bf16.msra.mxu0 %v234_v4  ;;  %258 = vmatpush.bf16.msra.mxu1 %v234_v4 }
  0x1e   :  { %259 = vmatpush.bf16.msra.mxu2 %v234_v4 }
  0x21   :  { %141 = vmatpush.bf16.msra.mxu0 %v233_v5  ;;  %260 = vmatpush.bf16.msra.mxu1 %v233_v5 }
  0x22   :  { %261 = vmatpush.bf16.msra.mxu2 %v233_v5 }
  0x25   :  { %142 = vmatpush.bf16.msra.mxu0 %v232_v6  ;;  %262 = vmatpush.bf16.msra.mxu1 %v232_v6 }
  0x26   :  { %263 = vmatpush.bf16.msra.mxu2 %v232_v6 }
  0x29   :  { %143 = vmatpush.bf16.msra.mxu0 %v231_v8  ;;  %264 = vmatpush.bf16.msra.mxu1 %v231_v8 }
  0x2a   :  { %265 = vmatpush.bf16.msra.mxu2 %v231_v8 }
  0x2c   :  { %144 = vmatmul.bf16.vlgmr.msra.gmra.mxu0 %v229_v10  ;;  %149 = vmatmul.bf16.vlgmr.msra.gmra.mxu1 %v230_v11 }
  0x2d   :  { %154 = vmatmul.bf16.vlgmr.msra.gmra.mxu2 %v84_v12 }
  0xa9   :  { %v145_v13 = vpop.f32.mrf.mxu0  ;;  %v150_v14 = vpop.f32.mrf.mxu1 }
  0xaa   :  { %v146_v20 = vadd.f32 %v271_v15, %v145_v13  ;;  %v151_v21 = vadd.f32 %v271_v15, %v150_v14 }
  0xb0   :  { %v155_v16 = vpop.f32.mrf.mxu2 }
  0xb1   :  { %v156_v17 = vadd.f32 %v271_v15, %v155_v16  ;;  %v147_v18 = vpop.f32.mrf.mxu0  ;;  %v152_v19 = vpop.f32.mrf.mxu1 }
  0xb2   :  { %v148_v22 = vadd.f32 %v271_v15, %v147_v18  ;;  %v153_v23 = vadd.f32 %v271_v15, %v152_v19 }
  0xb3   :  { %v163_v24 = vpack.c.bf16 %v156_v17, %v156_v17 }
  0xb4   :  { %v242_v25 = vpack.c.bf16 %v148_v22, %v146_v20  ;;  %v247_v26 = vpack.c.bf16 %v153_v23, %v151_v21 }
  0xb5   :  { %168 = vst [vmem:[#allocation7 + $0x10] sm:$0xf] %v163_v24 }
  0xb6   :  { %243 = vst [vmem:[#allocation7] sm:$0xff] %v242_v25  }
  0xb7   :  { %249 = vst [vmem:[#allocation7 + $0x8] sm:$0xff] %v247_v26  }
  0xb8   :  { %v157_v27 = vpop.f32.mrf.mxu2  ;;  %181 = dma.vmem_to_hbm [thread:$0]  %s174_s25, 320, %s176_s28, [#allocation4], %s351_s20, %s351_s20, %s352_s21  }
  0xb9   :  { %348 = dma.done.wait [#allocation4], 320  }
  0xba   :  { %349 = vsyncadd [#allocation4], 4294966976 }
  0xbb   :  { %186 = vsyncpa [#allocation3], 1 }
  0xbc   :  { %187 = vsyncpa [#allocation6], 1 }
  0xbd   :  { %188 = vsyncpa [#allocation4], 1 }

</bundles_post_ra>
